<compile_context>
chip_gen: v7x
topology: tpu7x:2x2x1
jax: 0.10.0
libtpu: 0.0.40
codegen_flags: <defaults>
</compile_context>

<pallas_src>
import jax
import jax.numpy as jnp
from jax.experimental import pallas as pl
from jax.experimental.pallas import tpu as pltpu


_LANE_CANDIDATES = (8192, 4096, 2048, 1024, 512, 256, 128)
_SMALL_BYTES = 1 << 20  # <= 1 MiB: single full-array block, skip the pipeline


def _identity_kernel(x_ref, o_ref):
    # Pass-through on the current VMEM tile.
    o_ref[...] = x_ref[...]


def _dma_identity_kernel(x_hbm_ref, o_hbm_ref, sem):
    # Whole-array HBM->HBM DMA: no VMEM round trip, no (8,128) constraints.
    cp = pltpu.make_async_copy(x_hbm_ref, o_hbm_ref, sem)
    cp.start()
    cp.wait()


def _min_sublanes(itemsize: int) -> int:
    # bf16 packs 16 rows per vreg, int8/fp8 pack 32: keep row blocks a
    # multiple of the packed-sublane count so stores stay unmasked.
    return 8 * max(1, 4 // max(1, itemsize))


def _pick_lane(total: int, min_rows: int):
    # Widest lane-dense slab (last dim a large multiple of 128) that still
    # fills the packed sublanes when possible.
    for cand in _LANE_CANDIDATES:
        if total % cand == 0 and total // cand >= min_rows:
            return cand
    for cand in _LANE_CANDIDATES:
        if total % cand == 0:
            return cand
    return None  # ragged: not a multiple of 128


def _generation_params():
    """Returns (tile_bytes, vmem_limit_bytes, prefer_dma) per TPU generation."""
    kind = ""
    try:
        kind = jax.devices()[0].device_kind.lower()
    except Exception:
        pass
    if "v7" in kind:
        # v7x: 3.2 TB/s HBM, 64 MiB physical VMEM.  Prefer the HBM->HBM DMA
        # path (no VMEM/vst round trip); keep 4 MiB tiles for the VMEM path.
        return 4 << 20, 32 << 20, True
    if "v6" in kind:
        # v6e: 4 MiB tiles -> 16 MiB of double buffers, well inside the
        # 32 MiB default scoped VMEM of the 128 MiB physical VMEM.
        return 4 << 20, 32 << 20, False
    # v5e / unknown: 2 MiB tiles -> 8 MiB of buffers fits the 16 MiB default
    # scoped VMEM with headroom.
    return 2 << 20, 16 << 20, False


def pass_layer(x: jax.Array) -> jax.Array:
    """PassLayer.forward: identity.  The fastest implementation is no kernel."""
    return x


def pass_layer_pallas_dma(x: jax.Array) -> jax.Array:
    """Identity as a single HBM->HBM DMA copy.

    No padding, no VMEM round trip, no layout constraints — handles ragged
    sizes directly and is the preferred large-copy path on v7x.
    """
    if x.ndim == 0 or x.size == 0:
        return x
    # TODO(synk): on v7x, split the copy into two halves across the two
    # TensorCores (core_map / CORE_PARALLEL) if a single TC's DMA issue path
    # cannot saturate chip HBM bandwidth.
    return pl.pallas_call(
        _dma_identity_kernel,
        out_shape=jax.ShapeDtypeStruct(x.shape, x.dtype),
        in_specs=[pl.BlockSpec(memory_space=pl.ANY)],
        out_specs=pl.BlockSpec(memory_space=pl.ANY),
        scratch_shapes=[pltpu.SemaphoreType.DMA(())],
        cost_estimate=pl.CostEstimate(
            flops=0, transcendentals=0,
            bytes_accessed=2 * x.size * x.dtype.itemsize),
    )(x)


def pass_layer_pallas(x: jax.Array, *, donate: bool = False) -> jax.Array:
    """Identity materialized as an explicit Pallas copy.

    donate=True adds input_output_aliases={0: 0}; only set it when the caller
    actually donates the input buffer (jax.jit donate_argnums), otherwise XLA
    inserts a defensive copy that negates the aliasing.  The DMA fallback path
    ignores `donate`.
    """
    if x.ndim == 0 or x.size == 0:
        return x

    orig_shape = x.shape
    dtype = x.dtype
    total = x.size
    itemsize = dtype.itemsize
    total_bytes = total * itemsize
    aliases = {0: 0} if donate else {}
    cost = pl.CostEstimate(flops=0, transcendentals=0,
                           bytes_accessed=2 * total_bytes)

    # Tiny inputs: one full-array VMEM block, no grid, no reshape — avoids
    # paying pipeline / per-step overhead where the copy is pure overhead.
    if total_bytes <= _SMALL_BYTES:
        return pl.pallas_call(
            _identity_kernel,
            out_shape=jax.ShapeDtypeStruct(orig_shape, dtype),
            input_output_aliases=aliases,
            cost_estimate=cost,
        )(x)

    tile_bytes, vmem_limit, prefer_dma = _generation_params()
    min_rows = _min_sublanes(itemsize)
    lane = _pick_lane(total, min_rows)

    # Ragged sizes (not a multiple of 128) and v7x: whole-array HBM->HBM DMA.
    # No pad/slice passes, no VMEM round trip.
    if lane is None or prefer_dma:
        return pass_layer_pallas_dma(x)

    rows = total // lane
    tile_rows = max(min_rows,
                    (tile_bytes // (lane * itemsize)) // min_rows * min_rows)
    tile_rows = min(tile_rows, rows)  # full-dim block is always legal
    grid = (pl.cdiv(rows, tile_rows),)  # ragged last block is masked by Pallas

    x2d = x.reshape(rows, lane)
    out = pl.pallas_call(
        _identity_kernel,
        out_shape=jax.ShapeDtypeStruct((rows, lane), dtype),
        grid=grid,
        in_specs=[pl.BlockSpec((tile_rows, lane), lambda i: (i, 0))],
        out_specs=pl.BlockSpec((tile_rows, lane), lambda i: (i, 0)),
        input_output_aliases=aliases,
        cost_estimate=cost,
        compiler_params=pltpu.CompilerParams(
            dimension_semantics=("parallel",),
            vmem_limit_bytes=vmem_limit,
        ),
    )(x2d)
    return out.reshape(orig_shape)


if __name__ == "__main__":
    key = jax.random.PRNGKey(0)
    # NCHW input, consistent with typical PyTorch usage of PassLayer.
    x = jax.random.normal(key, (2, 4, 16, 16), dtype=jnp.float32)

    y_fast = pass_layer(x)            # optimal path: identity, zero traffic
    y = pass_layer_pallas(x)          # explicit Pallas copy (VMEM block path)
    y_dma = pass_layer_pallas_dma(x)  # explicit HBM->HBM DMA copy
    jax.block_until_ready((y, y_dma))

    for out in (y_fast, y, y_dma):
        assert out.shape == x.shape, (out.shape, x.shape)
        assert out.dtype == x.dtype, (out.dtype, x.dtype)
        assert bool(jnp.all(out == x)), "identity mismatch"

    print("KERNEL_OK")
</pallas_src>

<mosaic_0001>
module attributes {stable_mosaic.version = 11 : i64} {
  func.func @_identity_kernel(%arg0: memref<2x4x16x16xf32, #tpu.memory_space<vmem>>, %arg1: memref<2x4x16x16xf32, #tpu.memory_space<vmem>>) attributes {dimension_semantics = [], scalar_prefetch = 0 : i64, scratch_operands = 0 : i64, tpu.core_type = #tpu.core_type<tc>} {
    %c0 = arith.constant 0 : index
    %c0_0 = arith.constant 0 : index
    %c0_1 = arith.constant 0 : index
    %c0_2 = arith.constant 0 : index
    %0 = vector.load %arg0[%c0, %c0_0, %c0_1, %c0_2] : memref<2x4x16x16xf32, #tpu.memory_space<vmem>>, vector<2x4x16x16xf32>
    %c0_3 = arith.constant 0 : index
    %c0_4 = arith.constant 0 : index
    %c0_5 = arith.constant 0 : index
    %c0_6 = arith.constant 0 : index
    %1 = vector.load %arg1[%c0_3, %c0_4, %c0_5, %c0_6] : memref<2x4x16x16xf32, #tpu.memory_space<vmem>>, vector<2x4x16x16xf32>
    tpu.vector_store %arg1[%c0_3, %c0_4, %c0_5, %c0_6], %0 {strides = array<i32>} : memref<2x4x16x16xf32, #tpu.memory_space<vmem>>, vector<2x4x16x16xf32>,
    return
  }
}

</mosaic_0001>

<bundles_post_ra>
// kernel: tpu_custom_call.1
= control target key start
LH: loop header
LB: loop body
LE: loop exit
PB: predicated region body
PF: predicated region fallthrough
CT: control target
= control target key end

     0   :  { %6 = vsyncpa [#allocation3], 0  ;;  %s185_s0 = inlined_call_operand.hbm [shape: f32[2,4,16,16], index: 0, kind: input, shape index: {}]   ;;  %s186_s1 = inlined_call_operand.hbm [shape: f32[2,4,16,16], index: 1, kind: output, shape index: {}]  }
   0x1   :  { %7 = vsyncpa [#allocation4], 0  ;;  %s125_s6 = smov [#allocation2]   ;;  %s77_s10 = scalar_lea.hbm %s185_s0, 2048 }
   0x2   :  { %s13_s7 = sshll.u32 %s125_s6, 4  ;;  %p78_p0 = scmp.ne.s32.totalorder %s185_s0, %s77_s10  ;;  %s14_s7 = int_to_ptr.vmem [resolvable:$true] %s13_s7 }
   0x3   :  { %p81_p1 = scmp.lt.u32.totalorder %s77_s10, %s185_s0 }
   0x5   :  { %p83_p2 = pnand %p81_p1, %p78_p0 }
   0x7   :  { %86 = shalt.err (!%p83_p2)
}
   0x8   :  { %s87_s15 = scalar_lea.vmem %s14_s7, 2048  ;;  %p92_p4 = scmp.lt.s32.totalorder %s14_s7, %s14_s7 }
   0x9   :  { %p88_p3 = scmp.ne.s32.totalorder %s14_s7, %s87_s15  ;;  %p93_p5 = scmp.lt.s32.totalorder %s87_s15, %s87_s15 }
   0xb   :  { %p94_p6 = por %p93_p5, %p92_p4 }
   0xd   :  { %p95_p7 = pnand %p94_p6, %p88_p3 }
   0xf   :  { %98 = shalt.err (!%p95_p7)
}
  0x10   :  { %s126_s16 = smov 128   ;;  %s127_s17 = smov 8  }
  0x11   :  { %19 = dma.hbm_to_vmem [thread:$0]  %s185_s0, 2048, %s14_s7, [#allocation3], %s126_s16, %s126_s16, %s127_s17  }
  0x12   :  { %121 = dma.done.wait [#allocation3], 2048  }
  0x13   :  { %122 = vsyncadd [#allocation3], 4294965248  ;;  %vm39_vm0 = vcmask 130048   ;;  %v23_v0 = vld [vmem:[#allocation2] sm:$0xff]  ;;  %v24_v1 = vld [vmem:[#allocation2 + $0x8] sm:$0xff]  ;;  %s128_s20 = smov [#allocation5]  }
  0x14   :  { %v25_v2 = vld [vmem:[#allocation2 + $0x10] sm:$0xff]  ;;  %40 = vst.msk [vmem:[#allocation5] sm:$0xff] %vm39_vm0, %v23_v0  ;;  %41 = vst.msk [vmem:[#allocation5 + $0x8] sm:$0xff] %vm39_vm0, %v24_v1  ;;  %v26_v3 = vld [vmem:[#allocation2 + $0x18] sm:$0xff]  ;;  %s61_s21 = sshll.u32 %s128_s20, 4  ;;  %s62_s21 = int_to_ptr.vmem [resolvable:$true] %s61_s21 }
  0x15   :  { %42 = vst.msk [vmem:[#allocation5 + $0x10] sm:$0xff] %vm39_vm0, %v25_v2  ;;  %v27_v4 = vld [vmem:[#allocation2 + $0x20] sm:$0xff]  ;;  %v28_v5 = vld [vmem:[#allocation2 + $0x28] sm:$0xff]  ;;  %43 = vst.msk [vmem:[#allocation5 + $0x18] sm:$0xff] %vm39_vm0, %v26_v3  ;;  %s99_s0 = scalar_lea.vmem %s62_s21, 2048  ;;  %p104_p9 = scmp.lt.s32.totalorder %s62_s21, %s62_s21 }
  0x16   :  { %44 = vst.msk [vmem:[#allocation5 + $0x20] sm:$0xff] %vm39_vm0, %v27_v4  ;;  %45 = vst.msk [vmem:[#allocation5 + $0x28] sm:$0xff] %vm39_vm0, %v28_v5  ;;  %v29_v6 = vld [vmem:[#allocation2 + $0x30] sm:$0xff]  ;;  %v30_v7 = vld [vmem:[#allocation2 + $0x38] sm:$0xff]  ;;  %p100_p8 = scmp.ne.s32.totalorder %s62_s21, %s99_s0  ;;  %p105_p10 = scmp.lt.s32.totalorder %s99_s0, %s99_s0 }
  0x17   :  { %v31_v8 = vld [vmem:[#allocation2 + $0x40] sm:$0xff]  ;;  %46 = vst.msk [vmem:[#allocation5 + $0x30] sm:$0xff] %vm39_vm0, %v29_v6  ;;  %47 = vst.msk [vmem:[#allocation5 + $0x38] sm:$0xff] %vm39_vm0, %v30_v7  ;;  %v32_v9 = vld [vmem:[#allocation2 + $0x48] sm:$0xff] }
  0x18   :  { %48 = vst.msk [vmem:[#allocation5 + $0x40] sm:$0xff] %vm39_vm0, %v31_v8  ;;  %v33_v10 = vld [vmem:[#allocation2 + $0x50] sm:$0xff]  ;;  %v34_v11 = vld [vmem:[#allocation2 + $0x58] sm:$0xff]  ;;  %49 = vst.msk [vmem:[#allocation5 + $0x48] sm:$0xff] %vm39_vm0, %v32_v9  ;;  %p106_p11 = por %p105_p10, %p104_p9 }
  0x19   :  { %50 = vst.msk [vmem:[#allocation5 + $0x50] sm:$0xff] %vm39_vm0, %v33_v10  ;;  %51 = vst.msk [vmem:[#allocation5 + $0x58] sm:$0xff] %vm39_vm0, %v34_v11  ;;  %v35_v12 = vld [vmem:[#allocation2 + $0x60] sm:$0xff]  ;;  %v36_v13 = vld [vmem:[#allocation2 + $0x68] sm:$0xff] }
  0x1a   :  { %v37_v14 = vld [vmem:[#allocation2 + $0x70] sm:$0xff]  ;;  %52 = vst.msk [vmem:[#allocation5 + $0x60] sm:$0xff] %vm39_vm0, %v35_v12  ;;  %53 = vst.msk [vmem:[#allocation5 + $0x68] sm:$0xff] %vm39_vm0, %v36_v13  ;;  %v38_v15 = vld [vmem:[#allocation2 + $0x78] sm:$0xff]  ;;  %p107_p12 = pnand %p106_p11, %p100_p8 }
  0x1b   :  { %54 = vst.msk [vmem:[#allocation5 + $0x70] sm:$0xff] %vm39_vm0, %v37_v14  ;;  %55 = vst.msk [vmem:[#allocation5 + $0x78] sm:$0xff] %vm39_vm0, %v38_v15 }
  0x1c   :  { %110 = shalt.err (!%p107_p12)
}
  0x1d   :  { %s111_s24 = scalar_lea.hbm %s186_s1, 2048 }
  0x1e   :  { %p112_p13 = scmp.ne.s32.totalorder %s186_s1, %s111_s24  ;;  %p115_p0 = scmp.lt.u32.totalorder %s111_s24, %s186_s1 }
  0x20   :  { %p117_p1 = pnand %p115_p0, %p112_p13 }
  0x22   :  { %120 = shalt.err (!%p117_p1)
}
  0x23   :  { %67 = dma.vmem_to_hbm [thread:$0]  %s62_s21, 2048, %s186_s1, [#allocation4], %s126_s16, %s126_s16, %s127_s17  }
  0x24   :  { %123 = dma.done.wait [#allocation4], 2048  }
  0x25   :  { %124 = vsyncadd [#allocation4], 4294965248 }
  0x26   :  { %71 = vsyncpa [#allocation3], 1 }
  0x27   :  { %72 = vsyncpa [#allocation4], 1 }

</bundles_post_ra>
